<compile_context>
chip_gen: v5e
topology: v5e:2x2
jax: 0.10.0
libtpu: 0.0.40
codegen_flags: <defaults>
</compile_context>

<pallas_src>
import functools

import jax
import jax.numpy as jnp
from jax.experimental import pallas as pl
from jax.experimental.pallas import tpu as pltpu


LANE = 128
SUBLANE = 8


def _ceil_to(n, m):
    return ((n + m - 1) // m) * m


def _pad_to(x, shape):
    pads = [(0, s - d) for d, s in zip(x.shape, shape)]
    return jnp.pad(x, pads)


def mlpsyn_kernel(h_ref, w1_ref, b1_ref, w2_ref, b2_ref, o_ref):
    # h_ref:  [TB, 100]  f32   (streamed over the batch)
    # w1_ref: [100, 128] f32   (VMEM-resident, hidden padded to 128)
    # b1_ref: [1, 128]   f32
    # w2_ref: [128, OUT] f32   (K padded to 128 with zero rows)
    # b2_ref: [1, OUT]   f32
    # o_ref:  [TB, OUT]  f32
    z1 = jnp.dot(h_ref[...], w1_ref[...],
                 preferred_element_type=jnp.float32) + b1_ref[...]
    a1 = jnp.maximum(z1, 0.0)                                   # ReLU (padded cols stay 0)
    z2 = jnp.dot(a1, w2_ref[...],
                 preferred_element_type=jnp.float32) + b2_ref[...]
    o_ref[...] = z2.astype(o_ref.dtype)


@functools.partial(jax.jit, static_argnames=("block_batch",))
def mlpsyn_forward(h, w1_t, b1, w2_t, b2, *, block_batch=4096):
    """h: [B, in]; w1_t: [in, hidden]; b1: [hidden]; w2_t: [hidden, out]; b2: [out]."""
    B, in_dim = h.shape
    hidden = w1_t.shape[1]
    out_dim = w2_t.shape[1]

    hid_p = _ceil_to(hidden, LANE)  # only the hidden (weight) axis is padded

    # Batch tile: multiple of 8 sublanes, capped at block_batch, and chosen so that
    # the 'parallel' batch axis has >= 2 grid steps when B is big enough (v7x megacore).
    tb = min(block_batch, max(SUBLANE, _ceil_to(-(-B // 2), SUBLANE)))
    grid = (pl.cdiv(B, tb),)

    # Pad weights/biases once (tiny, amortized over the whole batch); math stays exact.
    w1_p = _pad_to(w1_t.astype(jnp.float32), (in_dim, hid_p))
    b1_p = _pad_to(b1.reshape(1, -1).astype(jnp.float32), (1, hid_p))
    w2_p = _pad_to(w2_t.astype(jnp.float32), (hid_p, out_dim))
    b2_p = b2.reshape(1, -1).astype(jnp.float32)

    cost = pl.CostEstimate(
        flops=2 * B * (in_dim * hid_p + hid_p * out_dim),
        bytes_accessed=(B * in_dim * 4 + in_dim * hid_p * 4 + hid_p * out_dim * 4
                        + hid_p * 4 + out_dim * 4 + B * out_dim * 4),
        transcendentals=0,
    )

    out = pl.pallas_call(
        mlpsyn_kernel,
        out_shape=jax.ShapeDtypeStruct((B, out_dim), jnp.float32),
        grid=grid,
        in_specs=[
            pl.BlockSpec((tb, in_dim), lambda i: (i, 0)),      # stream h over batch
            pl.BlockSpec((in_dim, hid_p), lambda i: (0, 0)),   # weights resident in VMEM
            pl.BlockSpec((1, hid_p), lambda i: (0, 0)),
            pl.BlockSpec((hid_p, out_dim), lambda i: (0, 0)),
            pl.BlockSpec((1, out_dim), lambda i: (0, 0)),
        ],
        out_specs=pl.BlockSpec((tb, out_dim), lambda i: (i, 0)),
        compiler_params=pltpu.CompilerParams(
            dimension_semantics=("parallel",)),                 # megacore on v7x
        cost_estimate=cost,
    )(h.astype(jnp.float32), w1_p, b1_p, w2_p, b2_p)

    return out


def init_params(key, in_dim=100, hidden=100, out=2):
    """Deterministic init mirroring nn.Linear default U(-1/sqrt(fan_in), 1/sqrt(fan_in)).
    Weights stored pre-transposed as [in, out] so the kernel computes h @ W."""
    k1, k2, k3, k4 = jax.random.split(key, 4)
    bound1 = 1.0 / jnp.sqrt(in_dim)
    bound2 = 1.0 / jnp.sqrt(hidden)
    w1_t = jax.random.uniform(k1, (in_dim, hidden), jnp.float32, -bound1, bound1)
    b1 = jax.random.uniform(k2, (hidden,), jnp.float32, -bound1, bound1)
    w2_t = jax.random.uniform(k3, (hidden, out), jnp.float32, -bound2, bound2)
    b2 = jax.random.uniform(k4, (out,), jnp.float32, -bound2, bound2)
    return w1_t, b1, w2_t, b2


def reference_forward(h, w1_t, b1, w2_t, b2):
    z1 = jnp.maximum(h @ w1_t + b1[None, :], 0.0)
    return z1 @ w2_t + b2[None, :]


if __name__ == "__main__":
    key = jax.random.PRNGKey(0)
    kx, kx2, kp = jax.random.split(key, 3)

    w1_t, b1, w2_t, b2 = init_params(kp, in_dim=100, hidden=100, out=2)

    # Small, aligned batch.
    batch = 8
    h = jax.random.normal(kx, (batch, 100), jnp.float32)
    logits = jax.block_until_ready(mlpsyn_forward(h, w1_t, b1, w2_t, b2))
    ref = reference_forward(h, w1_t, b1, w2_t, b2)
    assert logits.shape == (batch, 2), logits.shape
    # f32 MXU matmuls -> much tighter tolerance than the previous bf16 version.
    assert jnp.allclose(logits, ref, atol=1e-2, rtol=1e-2), "mismatch vs reference"

    # Ragged batch (exercises the masked last grid block, no jnp.pad of h).
    batch2 = 37
    h2 = jax.random.normal(kx2, (batch2, 100), jnp.float32)
    logits2 = jax.block_until_ready(mlpsyn_forward(h2, w1_t, b1, w2_t, b2))
    ref2 = reference_forward(h2, w1_t, b1, w2_t, b2)
    assert logits2.shape == (batch2, 2), logits2.shape
    assert jnp.allclose(logits2, ref2, atol=1e-2, rtol=1e-2), "mismatch vs reference (ragged)"

    print("KERNEL_OK")
</pallas_src>

<mosaic_0001>
module attributes {stable_mosaic.version = 11 : i64} {
  func.func @mlpsyn_kernel(%arg0: i32, %arg1: memref<8x100xf32, #tpu.memory_space<vmem>>, %arg2: memref<100x128xf32, #tpu.memory_space<vmem>>, %arg3: memref<1x128xf32, #tpu.memory_space<vmem>>, %arg4: memref<128x2xf32, #tpu.memory_space<vmem>>, %arg5: memref<1x2xf32, #tpu.memory_space<vmem>>, %arg6: memref<8x2xf32, #tpu.memory_space<vmem>>) attributes {dimension_semantics = [#tpu.dimension_semantics<parallel>], iteration_bounds = array<i64: 1>, scalar_prefetch = 0 : i64, scratch_operands = 0 : i64, tpu.core_type = #tpu.core_type<tc>, window_params = [{transform_indices = @transform_0, window_bounds = array<i64: 8, 100>}, {pipeline_mode = #tpu.pipeline_mode<synchronous>, transform_indices = @transform_1, window_bounds = array<i64: 100, 128>}, {pipeline_mode = #tpu.pipeline_mode<synchronous>, transform_indices = @transform_2, window_bounds = array<i64: 1, 128>}, {pipeline_mode = #tpu.pipeline_mode<synchronous>, transform_indices = @transform_3, window_bounds = array<i64: 128, 2>}, {pipeline_mode = #tpu.pipeline_mode<synchronous>, transform_indices = @transform_4, window_bounds = array<i64: 1, 2>}, {transform_indices = @transform_5, window_bounds = array<i64: 8, 2>}]} {
    %c0 = arith.constant 0 : index
    %c0_0 = arith.constant 0 : index
    %0 = vector.load %arg1[%c0, %c0_0] : memref<8x100xf32, #tpu.memory_space<vmem>>, vector<8x100xf32>
    %c0_1 = arith.constant 0 : index
    %c0_2 = arith.constant 0 : index
    %1 = vector.load %arg2[%c0_1, %c0_2] : memref<100x128xf32, #tpu.memory_space<vmem>>, vector<100x128xf32>
    %cst = arith.constant dense<0.000000e+00> : vector<8x128xf32>
    %2 = tpu.matmul %0, %1, %cst {dimension_numbers = #tpu.dot_dimension_numbers<[1], [0], [0], [1], [0, 0, 1, 1], [], []>} : vector<8x100xf32>, vector<100x128xf32>, vector<8x128xf32> -> vector<8x128xf32>
    %c0_3 = arith.constant 0 : index
    %c0_4 = arith.constant 0 : index
    %3 = vector.load %arg3[%c0_3, %c0_4] : memref<1x128xf32, #tpu.memory_space<vmem>>, vector<1x128xf32>
    %4 = vector.broadcast %3 : vector<1x128xf32> to vector<8x128xf32>
    %5 = arith.addf %2, %4 : vector<8x128xf32>
    %cst_5 = arith.constant 0.000000e+00 : f32
    %6 = vector.broadcast %cst_5 : f32 to vector<8x128xf32>
    %7 = arith.maximumf %5, %6 : vector<8x128xf32>
    %c0_6 = arith.constant 0 : index
    %c0_7 = arith.constant 0 : index
    %8 = vector.load %arg4[%c0_6, %c0_7] : memref<128x2xf32, #tpu.memory_space<vmem>>, vector<128x2xf32>
    %cst_8 = arith.constant dense<0.000000e+00> : vector<8x2xf32>
    %9 = tpu.matmul %7, %8, %cst_8 {dimension_numbers = #tpu.dot_dimension_numbers<[1], [0], [0], [1], [0, 0, 1, 1], [], []>} : vector<8x128xf32>, vector<128x2xf32>, vector<8x2xf32> -> vector<8x2xf32>
    %c0_9 = arith.constant 0 : index
    %c0_10 = arith.constant 0 : index
    %10 = vector.load %arg5[%c0_9, %c0_10] : memref<1x2xf32, #tpu.memory_space<vmem>>, vector<1x2xf32>
    %11 = vector.broadcast %10 : vector<1x2xf32> to vector<8x2xf32>
    %12 = arith.addf %9, %11 : vector<8x2xf32>
    %c0_11 = arith.constant 0 : index
    %c0_12 = arith.constant 0 : index
    %13 = vector.load %arg6[%c0_11, %c0_12] : memref<8x2xf32, #tpu.memory_space<vmem>>, vector<8x2xf32>
    tpu.vector_store %arg6[%c0_11, %c0_12], %12 {strides = array<i32>} : memref<8x2xf32, #tpu.memory_space<vmem>>, vector<8x2xf32>,
    return
  }
  func.func @transform_0(%arg0: i32) -> (i32, i32) {
    %c0_i32 = arith.constant 0 : i32
    %c0_i32_0 = arith.constant 0 : i32
    return %arg0, %c0_i32 : i32, i32
  }
  func.func @transform_1(%arg0: i32) -> (i32, i32) {
    %c0_i32 = arith.constant 0 : i32
    %c0_i32_0 = arith.constant 0 : i32
    %c0_i32_1 = arith.constant 0 : i32
    return %c0_i32, %c0_i32_0 : i32, i32
  }
  func.func @transform_2(%arg0: i32) -> (i32, i32) {
    %c0_i32 = arith.constant 0 : i32
    %c0_i32_0 = arith.constant 0 : i32
    %c0_i32_1 = arith.constant 0 : i32
    return %c0_i32, %c0_i32_0 : i32, i32
  }
  func.func @transform_3(%arg0: i32) -> (i32, i32) {
    %c0_i32 = arith.constant 0 : i32
    %c0_i32_0 = arith.constant 0 : i32
    %c0_i32_1 = arith.constant 0 : i32
    return %c0_i32, %c0_i32_0 : i32, i32
  }
  func.func @transform_4(%arg0: i32) -> (i32, i32) {
    %c0_i32 = arith.constant 0 : i32
    %c0_i32_0 = arith.constant 0 : i32
    %c0_i32_1 = arith.constant 0 : i32
    return %c0_i32, %c0_i32_0 : i32, i32
  }
  func.func @transform_5(%arg0: i32) -> (i32, i32) {
    %c0_i32 = arith.constant 0 : i32
    %c0_i32_0 = arith.constant 0 : i32
    return %arg0, %c0_i32 : i32, i32
  }
}

</mosaic_0001>

<bundles_post_ra>
// kernel: mlpsyn_forward.1
= control target key start
LH: loop header
LB: loop body
LE: loop exit
PB: predicated region body
PF: predicated region fallthrough
CT: control target
= control target key end

     0   :  { %vm42_vm0 = vcmask 1043456   ;;  %vm38_vm1 = vcmask 818176   ;;  %vm107_vm2 = vcmask 15360   ;;  %s246_s1 = inlined_call_operand.vmem [shape: f32[100,128], index: 1, kind: input, shape index: {}]   ;;  %s247_s3 = inlined_call_operand.vmem [shape: f32[128,2], index: 3, kind: input, shape index: {}]   ;;  %s248_s2 = inlined_call_operand.vmem [shape: f32[1,128], index: 2, kind: input, shape index: {}]   ;;  %s249_s0 = inlined_call_operand.vmem [shape: f32[8,100], index: 0, kind: input, shape index: {}]   ;;  %s250_s4 = inlined_call_operand.vmem [shape: f32[1,2], index: 4, kind: input, shape index: {}]   ;;  %s251_s5 = inlined_call_operand.vmem [shape: f32[8,2], index: 5, kind: output, shape index: {}]  }
   0x1   :  { %v33_v0 = vld [vmem:[%s246_s1 + $0x60] sm:$0xf]  ;;  %v32_v1 = vld [vmem:[%s246_s1 + $0x58] sm:$0xff]  ;;  %v31_v2 = vld [vmem:[%s246_s1 + $0x50] sm:$0xff] }
   0x2   :  { %113 = vmatpush.msk.msra.mxu0 %vm42_vm0, %v33_v0  ;;  %v30_v3 = vld [vmem:[%s246_s1 + $0x48] sm:$0xff]  ;;  %v82_v4 = vld [vmem:[%s247_s3 + $0x78] sm:$0xff]  ;;  %v81_v5 = vld [vmem:[%s247_s3 + $0x70] sm:$0xff] }
   0x3   :  { %87 = vmatpush.msra.mxu1 %v82_v4  ;;  %v29_v6 = vld [vmem:[%s246_s1 + $0x40] sm:$0xff]  ;;  %v80_v7 = vld [vmem:[%s247_s3 + $0x68] sm:$0xff]  ;;  %v28_v8 = vld [vmem:[%s246_s1 + $0x38] sm:$0xff] }
   0x4   :  { %50 = vmatpush.msra.mxu0 %v32_v1  ;;  %v79_v9 = vld [vmem:[%s247_s3 + $0x60] sm:$0xff]  ;;  %v27_v10 = vld [vmem:[%s246_s1 + $0x30] sm:$0xff]  ;;  %v78_v11 = vld [vmem:[%s247_s3 + $0x58] sm:$0xff] }
   0x5   :  { %88 = vmatpush.msra.mxu1 %v81_v5  ;;  %v26_v12 = vld [vmem:[%s246_s1 + $0x28] sm:$0xff]  ;;  %v77_v13 = vld [vmem:[%s247_s3 + $0x50] sm:$0xff]  ;;  %v25_v14 = vld [vmem:[%s246_s1 + $0x20] sm:$0xff] }
   0x6   :  { %51 = vmatpush.msra.mxu0 %v31_v2  ;;  %v76_v15 = vld [vmem:[%s247_s3 + $0x48] sm:$0xff]  ;;  %v24_v16 = vld [vmem:[%s246_s1 + $0x18] sm:$0xff]  ;;  %v75_v17 = vld [vmem:[%s247_s3 + $0x40] sm:$0xff] }
   0x7   :  { %89 = vmatpush.msra.mxu1 %v80_v7  ;;  %v23_v18 = vld [vmem:[%s246_s1 + $0x10] sm:$0xff]  ;;  %v74_v19 = vld [vmem:[%s247_s3 + $0x38] sm:$0xff]  ;;  %v22_v20 = vld [vmem:[%s246_s1 + $0x8] sm:$0xff] }
   0x8   :  { %52 = vmatpush.msra.mxu0 %v30_v3  ;;  %v73_v21 = vld [vmem:[%s247_s3 + $0x30] sm:$0xff]  ;;  %v21_v22 = vld [vmem:[%s246_s1] sm:$0xff]  ;;  %v72_v23 = vld [vmem:[%s247_s3 + $0x28] sm:$0xff] }
   0x9   :  { %90 = vmatpush.msra.mxu1 %v79_v9  ;;  %v20_v24 = vld [vmem:[%s249_s0] sm:$0xff]  ;;  %v70_v26 = vld [vmem:[%s247_s3 + $0x18] sm:$0xff]  ;;  %v69_v27 = vld [vmem:[%s247_s3 + $0x10] sm:$0xff] }
   0xa   :  { %53 = vmatpush.msra.mxu0 %v29_v6  ;;  %v71_v25 = vld [vmem:[%s247_s3 + $0x20] sm:$0xff]  ;;  %v68_v28 = vld [vmem:[%s247_s3 + $0x8] sm:$0xff] }
   0xb   :  { %91 = vmatpush.msra.mxu1 %v78_v11  ;;  %v67_v29 = vld [vmem:[%s247_s3] sm:$0xff] }
   0xc   :  { %54 = vmatpush.msra.mxu0 %v28_v8  ;;  %v115_v30 = vld [vmem:[%s248_s2] ss:$0 sm:$0xff] }
   0xd   :  { %92 = vmatpush.msra.mxu1 %v77_v13  ;;  %v116_v34 = vld [vmem:[%s250_s4] ss:$0 sm:$0xff] }
   0xe   :  { %55 = vmatpush.msra.mxu0 %v27_v10 }
   0xf   :  { %93 = vmatpush.msra.mxu1 %v76_v15 }
  0x10   :  { %56 = vmatpush.msra.mxu0 %v26_v12 }
  0x11   :  { %94 = vmatpush.msra.mxu1 %v75_v17 }
  0x12   :  { %57 = vmatpush.msra.mxu0 %v25_v14 }
  0x13   :  { %95 = vmatpush.msra.mxu1 %v74_v19 }
  0x14   :  { %58 = vmatpush.msra.mxu0 %v24_v16 }
  0x15   :  { %96 = vmatpush.msra.mxu1 %v73_v21 }
  0x16   :  { %59 = vmatpush.msra.mxu0 %v23_v18 }
  0x17   :  { %97 = vmatpush.msra.mxu1 %v72_v23 }
  0x18   :  { %60 = vmatpush.msra.mxu0 %v22_v20 }
  0x19   :  { %98 = vmatpush.msra.mxu1 %v71_v25 }
  0x1a   :  { %61 = vmatpush.msra.mxu0 %v21_v22 }
  0x1b   :  { %114 = vmatmul.msk.f32.vlgmr.msra.gmra.mxu0 %vm38_vm1, %v20_v24  ;;  %99 = vmatpush.msra.mxu1 %v70_v26 }
  0x1d   :  { %100 = vmatpush.msra.mxu1 %v69_v27 }
  0x1f   :  { %101 = vmatpush.msra.mxu1 %v68_v28 }
  0x21   :  { %102 = vmatpush.msra.mxu1 %v67_v29 }
  0x98   :  { %v63_v31 = vpop.f32.mrf.mxu0 }
  0x99   :  { %v64_v32 = vadd.f32 %v115_v30, %v63_v31 }
  0x9b   :  { %v66_v33 = vmax.f32 %v64_v32, 0.0 }
  0x9d   :  { %103 = vmatmul.f32.vlgmr.msra.gmra.mxu1 %v66_v33 }
 0x11a   :  { %v104_v35 = vpop.f32.mrf.mxu1 }
 0x11b   :  { %v105_v36 = vadd.f32 %v116_v34, %v104_v35 }
 0x11d   :  { %108 = vst.msk [vmem:[%s251_s5] sm:$0xff] %vm107_vm2, %v105_v36 }

</bundles_post_ra>
